<compile_context>
chip_gen: v6e
topology: v6e:2x2x1
jax: 0.10.0
libtpu: 0.0.40
codegen_flags: <defaults>
</compile_context>

<pallas_src>
import functools

import jax
import jax.numpy as jnp
import numpy as np
from jax.experimental import pallas as pl
from jax.experimental.pallas import tpu as pltpu

# ----------------------------------------------------------------------------
# Synthetic config (stands in for config.prosody.json['predictor'] / ['s4'])
# ----------------------------------------------------------------------------
EMB_DIM = 32     # emb_dim
COND_DIM = 32    # cond_dim
N_LAYERS = 2     # n_layers
N_FREQ = 16      # n_freq
LN_EPS = 1e-5    # torch.nn.LayerNorm default eps

B = 2            # batch
T = 8            # sequence length


# ----------------------------------------------------------------------------
# Packing layout (8-row aligned sections inside the single parameter blob)
# ----------------------------------------------------------------------------
def _rup(n, m):
    return ((n + m - 1) // m) * m


def _layout(t, e, d, n_layers):
    r_freq = _rup(e, 8)                     # freq (+ folded b_in) rows
    r_layers = r_freq + _rup(t, 8)          # start of per-layer sections
    r_ws4 = _rup(t * t, 8)                  # within layer: pointwise weight
    r_bs4 = r_ws4 + _rup(d, 8)              # within layer: pointwise bias
    layer_rows = r_bs4 + 8
    r_hw = r_layers + n_layers * layer_rows  # merged head weight ([D,2] in cols 0:2)
    r_hb = r_hw + _rup(d, 8)                 # merged head bias   (cols 0:2)
    total_rows = r_hb + 8
    return dict(r_freq=r_freq, r_layers=r_layers, r_ws4=r_ws4, r_bs4=r_bs4,
                layer_rows=layer_rows, r_hw=r_hw, r_hb=r_hb,
                total_rows=total_rows)


# ----------------------------------------------------------------------------
# Kernel: one program per batch element, whole forward pass on a [T, D] tile.
# ----------------------------------------------------------------------------
def prosody_kernel(x_ref, p_ref, out_ref, *,
                   seq_len, n_layers, emb_dim, cond_dim,
                   r_freq, r_layers, layer_rows, r_ws4, r_bs4, r_hw, r_hb):
    x = x_ref[0]                                              # [T, E]

    # input_proj + (freq positional embedding with b_in folded in)
    h = (jnp.dot(x, p_ref[0:emb_dim, :],
                 preferred_element_type=jnp.float32)
         + p_ref[r_freq:r_freq + seq_len, :])                 # [T, D]

    # --- S4 layers (simplified stand-in, see TODO(synk) above) --------------
    for l in range(n_layers):
        base = r_layers + l * layer_rows

        # causal depthwise conv: y[t,d] = sum_{s<=t} k[s,d] * h[t-s,d].
        # km[s] rows carry the causal mask (and, for s=0, the folded D-skip),
        # so the body is roll (XLU) + mul + add only.
        # TODO(synk): for large seq_len restructure as fori_loop / FFT path.
        y = h * p_ref[base:base + seq_len, :]                 # s = 0 tap
        for s in range(1, seq_len):
            rolled = pltpu.roll(h, shift=s, axis=0)
            y = y + rolled * p_ref[base + s * seq_len:
                                   base + (s + 1) * seq_len, :]

        # TODO(synk): torch.nn.GELU default is exact erf; tanh approx used here
        y = jax.nn.gelu(y)
        y = (jnp.dot(y, p_ref[base + r_ws4:base + r_ws4 + cond_dim, :],
                     preferred_element_type=jnp.float32)
             + p_ref[base + r_bs4:base + r_bs4 + 1, :])
        h = h + y                                             # residual

    # --- heads: shared LayerNorm statistics; gamma/beta folded into the
    #     merged head weight/bias (built in the wrapper) ---------------------
    mean = jnp.mean(h, axis=-1, keepdims=True)
    var = jnp.mean((h - mean) ** 2, axis=-1, keepdims=True)
    hn = (h - mean) * jax.lax.rsqrt(var + LN_EPS)

    # head weight lives in cols 0:2 of a zero-padded [D, D] section.
    o = (jnp.dot(hn, p_ref[r_hw:r_hw + cond_dim, :],
                 preferred_element_type=jnp.float32)
         + p_ref[r_hb:r_hb + 1, :])                           # [T, D]
    out_ref[0] = o[:, 0:2]                                    # [T, 2]


# ----------------------------------------------------------------------------
# Parameters / freq table / packing
# ----------------------------------------------------------------------------
def make_params(key):
    ks = jax.random.split(key, 10)
    scale = 0.02
    params = {}
    params["w_in"] = jax.random.normal(ks[0], (EMB_DIM, COND_DIM),
                                       jnp.float32) * scale
    params["b_in"] = jax.random.normal(ks[1], (1, COND_DIM), jnp.float32) * 0.01

    # simplified-S4 per-layer parameters
    decay = jnp.exp(-0.3 * jnp.arange(T, dtype=jnp.float32))[None, :, None]
    params["k_all"] = (jax.random.normal(ks[2], (N_LAYERS, T, COND_DIM),
                                         jnp.float32) * 0.1) * decay
    params["dskip"] = jax.random.normal(ks[3], (N_LAYERS, 1, COND_DIM),
                                        jnp.float32) * 0.1
    params["w_s4"] = jax.random.normal(ks[4], (N_LAYERS, COND_DIM, COND_DIM),
                                       jnp.float32) * scale
    params["b_s4"] = jax.random.normal(ks[5], (N_LAYERS, 1, COND_DIM),
                                       jnp.float32) * 0.01

    # heads: index 0 = f0, index 1 = energy (non-trivial gamma/beta so the
    # LayerNorm folding is actually exercised by the correctness check)
    params["ln_g"] = 1.0 + jax.random.normal(ks[6], (2, 1, COND_DIM),
                                             jnp.float32) * 0.1
    params["ln_b"] = jax.random.normal(ks[7], (2, 1, COND_DIM), jnp.float32) * 0.1
    params["head_w"] = jax.random.normal(ks[8], (2, COND_DIM, 1),
                                         jnp.float32) * scale
    params["head_b"] = jax.random.normal(ks[9], (2, 1, 1), jnp.float32) * 0.1
    return params


def freq_pos_embed_table():
    """Deterministic sinusoidal FreqPosEmbed table, shape [n_freq, cond_dim]."""
    pos = jnp.arange(N_FREQ, dtype=jnp.float32)[:, None]
    i = jnp.arange(COND_DIM, dtype=jnp.float32)[None, :]
    angle = pos / jnp.power(10000.0, 2.0 * jnp.floor(i / 2.0) / COND_DIM)
    return jnp.where((jnp.arange(COND_DIM) % 2 == 0)[None, :],
                     jnp.sin(angle), jnp.cos(angle)).astype(jnp.float32)


def freq_for_length(t_len):
    """Replicates the forward's trim / repeat-last-frame pad logic -> [T, D]."""
    table = freq_pos_embed_table()           # [n_freq, D]
    freq = table.T                            # [D, n_freq]  (= permute(0,2,1))
    if freq.shape[1] >= t_len:
        freq = freq[:, :t_len]
    else:
        pad = jnp.repeat(freq[:, -1:], t_len - freq.shape[1], axis=1)
        freq = jnp.concatenate([freq, pad], axis=1)
    return freq.T                             # [T, D]  (= permute back)


def pack_params(params, t):
    """Consolidate all parameter tensors into ONE DMA-friendly [R, D] blob."""
    e = params["w_in"].shape[0]
    d = params["w_in"].shape[1]
    n_layers = params["k_all"].shape[0]
    lay = _layout(t, e, d, n_layers)

    blob = jnp.zeros((lay["total_rows"], d), jnp.float32)
    blob = blob.at[0:e].set(params["w_in"])

    # freq positional embedding with the input-proj bias folded in
    blob = blob.at[lay["r_freq"]:lay["r_freq"] + t].set(
        freq_for_length(t) + params["b_in"])

    # per-layer: masked conv taps (dskip folded into s=0) | pointwise W | b
    caus = (jnp.arange(t)[None, :] >= jnp.arange(t)[:, None]
            ).astype(jnp.float32)                             # [s, t_row]
    for l in range(n_layers):
        k_l = params["k_all"][l]                              # [T, D]
        k_l = k_l.at[0].add(params["dskip"][l, 0])            # fold D-skip
        km = (caus[:, :, None] * k_l[:, None, :]).reshape(t * t, d)
        base = lay["r_layers"] + l * lay["layer_rows"]
        blob = blob.at[base:base + t * t].set(km)
        blob = blob.at[base + lay["r_ws4"]:
                       base + lay["r_ws4"] + d].set(params["w_s4"][l])
        blob = blob.at[base + lay["r_bs4"]:
                       base + lay["r_bs4"] + 1].set(params["b_s4"][l])

    # merged head: fold LayerNorm gamma/beta into the head Linear.
    #   (hn*g + be) @ w + c  ==  hn @ (g*w)  +  (be.w + c)
    g = params["ln_g"][:, 0, :]        # [2, D]
    be = params["ln_b"][:, 0, :]       # [2, D]
    w = params["head_w"][:, :, 0]      # [2, D]
    c = params["head_b"][:, 0, 0]      # [2]
    head_w = (g * w).T                                         # [D, 2]
    head_b = jnp.sum(be * w, axis=-1) + c                      # [2]
    blob = blob.at[lay["r_hw"]:lay["r_hw"] + d, 0:2].set(head_w)
    blob = blob.at[lay["r_hb"], 0:2].set(head_b)
    return blob


# ----------------------------------------------------------------------------
# Wrapper
# ----------------------------------------------------------------------------
@functools.partial(jax.jit, static_argnames=("n_layers",))
def prosody_predictor_v15(text_emb, blob, n_layers=N_LAYERS):
    b, t, e = text_emb.shape
    rows, d = blob.shape
    lay = _layout(t, e, d, n_layers)
    assert rows == lay["total_rows"]

    kernel = functools.partial(
        prosody_kernel,
        seq_len=t, n_layers=n_layers, emb_dim=e, cond_dim=d,
        r_freq=lay["r_freq"], r_layers=lay["r_layers"],
        layer_rows=lay["layer_rows"], r_ws4=lay["r_ws4"], r_bs4=lay["r_bs4"],
        r_hw=lay["r_hw"], r_hb=lay["r_hb"])

    flops = b * (2 * t * e * d                      # input proj
                 + n_layers * (2 * t * t * d        # depthwise conv taps
                               + 2 * t * d * d)     # pointwise Linear
                 + 2 * t * d * d)                   # merged head matmul
    bytes_accessed = (text_emb.size + blob.size + b * t * 2) * 4
    transcendentals = b * n_layers * t * d          # GELU

    out = pl.pallas_call(
        kernel,
        out_shape=jax.ShapeDtypeStruct((b, t, 2), jnp.float32),
        grid=(b,),
        in_specs=[
            pl.BlockSpec((1, t, e), lambda i: (i, 0, 0)),     # text_emb tile
            pl.BlockSpec((rows, d), lambda i: (0, 0)),        # param blob
        ],
        out_specs=pl.BlockSpec((1, t, 2), lambda i: (i, 0, 0)),
        compiler_params=pltpu.CompilerParams(
            dimension_semantics=("parallel",)),
        cost_estimate=pl.CostEstimate(flops=flops,
                                      transcendentals=transcendentals,
                                      bytes_accessed=bytes_accessed),
    )(text_emb, blob)

    return {"f0": out[..., 0], "energy": out[..., 1]}


# ----------------------------------------------------------------------------
# Pure-JAX reference (unpacked math, per-batch shifting) for correctness check
# ----------------------------------------------------------------------------
def reference_forward(text_emb, params):
    freq = freq_for_length(text_emb.shape[1])
    h = jnp.einsum("bte,ed->btd", text_emb, params["w_in"]) + params["b_in"]
    h = h + freq[None]
    for l in range(params["k_all"].shape[0]):
        k_l = params["k_all"][l]
        y = h * k_l[0]
        for s in range(1, h.shape[1]):
            shifted = jnp.concatenate(
                [jnp.zeros((h.shape[0], s, COND_DIM), jnp.float32),
                 h[:, : h.shape[1] - s, :]], axis=1)
            y = y + shifted * k_l[s]
        y = y + h * params["dskip"][l]
        y = jax.nn.gelu(y)
        y = jnp.einsum("btd,de->bte", y, params["w_s4"][l]) + params["b_s4"][l]
        h = h + y
    outs = []
    for i in range(2):
        mean = jnp.mean(h, axis=-1, keepdims=True)
        var = jnp.mean((h - mean) ** 2, axis=-1, keepdims=True)
        hn = (h - mean) * jax.lax.rsqrt(var + LN_EPS)
        hn = hn * params["ln_g"][i] + params["ln_b"][i]
        o = jnp.einsum("btd,do->bto", hn, params["head_w"][i]) + params["head_b"][i]
        outs.append(o[..., 0])
    return {"f0": outs[0], "energy": outs[1]}


if __name__ == "__main__":
    key = jax.random.PRNGKey(0)
    pkey, xkey = jax.random.split(key)
    params = make_params(pkey)
    text_emb = jax.random.normal(xkey, (B, T, EMB_DIM), jnp.float32)

    blob = pack_params(params, T)
    out = prosody_predictor_v15(text_emb, blob, n_layers=N_LAYERS)
    jax.block_until_ready(out)

    ref = reference_forward(text_emb, params)
    np.testing.assert_allclose(np.asarray(out["f0"]), np.asarray(ref["f0"]),
                               rtol=1e-4, atol=1e-4)
    np.testing.assert_allclose(np.asarray(out["energy"]),
                               np.asarray(ref["energy"]),
                               rtol=1e-4, atol=1e-4)
    assert out["f0"].shape == (B, T) and out["energy"].shape == (B, T)
    print("KERNEL_OK")
</pallas_src>

<mosaic_0001>
module attributes {stable_mosaic.version = 11 : i64} {
  func.func @prosody_kernel(%arg0: i32, %arg1: memref<1x8x32xf32, #tpu.memory_space<vmem>>, %arg2: memref<288x32xf32, #tpu.memory_space<vmem>>, %arg3: memref<1x8x2xf32, #tpu.memory_space<vmem>>) attributes {dimension_semantics = [#tpu.dimension_semantics<parallel>], iteration_bounds = array<i64: 2>, scalar_prefetch = 0 : i64, scratch_operands = 0 : i64, tpu.core_type = #tpu.core_type<tc>, window_params = [{transform_indices = @transform_0, window_bounds = array<i64: 1, 8, 32>}, {pipeline_mode = #tpu.pipeline_mode<synchronous>, transform_indices = @transform_1, window_bounds = array<i64: 288, 32>}, {transform_indices = @transform_2, window_bounds = array<i64: 1, 8, 2>}]} {
    %c0 = arith.constant 0 : index
    %c0_0 = arith.constant 0 : index
    %c0_1 = arith.constant 0 : index
    %0 = vector.load %arg1[%c0, %c0_0, %c0_1] : memref<1x8x32xf32, #tpu.memory_space<vmem>>, vector<1x8x32xf32>
    %1 = vector.shape_cast %0 : vector<1x8x32xf32> to vector<8x32xf32>
    %c0_2 = arith.constant 0 : index
    %c0_3 = arith.constant 0 : index
    %2 = vector.load %arg2[%c0_2, %c0_3] : memref<288x32xf32, #tpu.memory_space<vmem>>, vector<32x32xf32>
    %cst = arith.constant dense<0.000000e+00> : vector<8x32xf32>
    %3 = tpu.matmul %1, %2, %cst {dimension_numbers = #tpu.dot_dimension_numbers<[1], [0], [0], [1], [0, 0, 1, 1], [], []>} : vector<8x32xf32>, vector<32x32xf32>, vector<8x32xf32> -> vector<8x32xf32>
    %c32 = arith.constant 32 : index
    %c0_4 = arith.constant 0 : index
    %4 = vector.load %arg2[%c32, %c0_4] : memref<288x32xf32, #tpu.memory_space<vmem>>, vector<8x32xf32>
    %5 = arith.addf %3, %4 : vector<8x32xf32>
    %c40 = arith.constant 40 : index
    %c0_5 = arith.constant 0 : index
    %6 = vector.load %arg2[%c40, %c0_5] : memref<288x32xf32, #tpu.memory_space<vmem>>, vector<8x32xf32>
    %7 = arith.mulf %5, %6 : vector<8x32xf32>
    %c1_i32 = arith.constant 1 : i32
    %8 = tpu.dynamic_rotate %5 by %c1_i32 dim 0 : vector<8x32xf32>, i32 -> vector<8x32xf32>
    %c48 = arith.constant 48 : index
    %c0_6 = arith.constant 0 : index
    %9 = vector.load %arg2[%c48, %c0_6] : memref<288x32xf32, #tpu.memory_space<vmem>>, vector<8x32xf32>
    %10 = arith.mulf %8, %9 : vector<8x32xf32>
    %11 = arith.addf %7, %10 : vector<8x32xf32>
    %c2_i32 = arith.constant 2 : i32
    %12 = tpu.dynamic_rotate %5 by %c2_i32 dim 0 : vector<8x32xf32>, i32 -> vector<8x32xf32>
    %c56 = arith.constant 56 : index
    %c0_7 = arith.constant 0 : index
    %13 = vector.load %arg2[%c56, %c0_7] : memref<288x32xf32, #tpu.memory_space<vmem>>, vector<8x32xf32>
    %14 = arith.mulf %12, %13 : vector<8x32xf32>
    %15 = arith.addf %11, %14 : vector<8x32xf32>
    %c3_i32 = arith.constant 3 : i32
    %16 = tpu.dynamic_rotate %5 by %c3_i32 dim 0 : vector<8x32xf32>, i32 -> vector<8x32xf32>
    %c64 = arith.constant 64 : index
    %c0_8 = arith.constant 0 : index
    %17 = vector.load %arg2[%c64, %c0_8] : memref<288x32xf32, #tpu.memory_space<vmem>>, vector<8x32xf32>
    %18 = arith.mulf %16, %17 : vector<8x32xf32>
    %19 = arith.addf %15, %18 : vector<8x32xf32>
    %c4_i32 = arith.constant 4 : i32
    %20 = tpu.dynamic_rotate %5 by %c4_i32 dim 0 : vector<8x32xf32>, i32 -> vector<8x32xf32>
    %c72 = arith.constant 72 : index
    %c0_9 = arith.constant 0 : index
    %21 = vector.load %arg2[%c72, %c0_9] : memref<288x32xf32, #tpu.memory_space<vmem>>, vector<8x32xf32>
    %22 = arith.mulf %20, %21 : vector<8x32xf32>
    %23 = arith.addf %19, %22 : vector<8x32xf32>
    %c5_i32 = arith.constant 5 : i32
    %24 = tpu.dynamic_rotate %5 by %c5_i32 dim 0 : vector<8x32xf32>, i32 -> vector<8x32xf32>
    %c80 = arith.constant 80 : index
    %c0_10 = arith.constant 0 : index
    %25 = vector.load %arg2[%c80, %c0_10] : memref<288x32xf32, #tpu.memory_space<vmem>>, vector<8x32xf32>
    %26 = arith.mulf %24, %25 : vector<8x32xf32>
    %27 = arith.addf %23, %26 : vector<8x32xf32>
    %c6_i32 = arith.constant 6 : i32
    %28 = tpu.dynamic_rotate %5 by %c6_i32 dim 0 : vector<8x32xf32>, i32 -> vector<8x32xf32>
    %c88 = arith.constant 88 : index
    %c0_11 = arith.constant 0 : index
    %29 = vector.load %arg2[%c88, %c0_11] : memref<288x32xf32, #tpu.memory_space<vmem>>, vector<8x32xf32>
    %30 = arith.mulf %28, %29 : vector<8x32xf32>
    %31 = arith.addf %27, %30 : vector<8x32xf32>
    %c7_i32 = arith.constant 7 : i32
    %32 = tpu.dynamic_rotate %5 by %c7_i32 dim 0 : vector<8x32xf32>, i32 -> vector<8x32xf32>
    %c96 = arith.constant 96 : index
    %c0_12 = arith.constant 0 : index
    %33 = vector.load %arg2[%c96, %c0_12] : memref<288x32xf32, #tpu.memory_space<vmem>>, vector<8x32xf32>
    %34 = arith.mulf %32, %33 : vector<8x32xf32>
    %35 = arith.addf %31, %34 : vector<8x32xf32>
    %36 = arith.mulf %35, %35 : vector<8x32xf32>
    %37 = arith.mulf %35, %36 : vector<8x32xf32>
    %cst_13 = arith.constant 4.471500e-02 : f32
    %38 = vector.broadcast %cst_13 : f32 to vector<8x32xf32>
    %39 = arith.mulf %38, %37 : vector<8x32xf32>
    %40 = arith.addf %35, %39 : vector<8x32xf32>
    %cst_14 = arith.constant 0.797884583 : f32
    %41 = vector.broadcast %cst_14 : f32 to vector<8x32xf32>
    %42 = arith.mulf %41, %40 : vector<8x32xf32>
    %43 = math.tanh %42 : vector<8x32xf32>
    %cst_15 = arith.constant 1.000000e+00 : f32
    %44 = vector.broadcast %cst_15 : f32 to vector<8x32xf32>
    %45 = arith.addf %44, %43 : vector<8x32xf32>
    %cst_16 = arith.constant 5.000000e-01 : f32
    %46 = vector.broadcast %cst_16 : f32 to vector<8x32xf32>
    %47 = arith.mulf %46, %45 : vector<8x32xf32>
    %48 = arith.mulf %35, %47 : vector<8x32xf32>
    %c104 = arith.constant 104 : index
    %c0_17 = arith.constant 0 : index
    %49 = vector.load %arg2[%c104, %c0_17] : memref<288x32xf32, #tpu.memory_space<vmem>>, vector<32x32xf32>
    %cst_18 = arith.constant dense<0.000000e+00> : vector<8x32xf32>
    %50 = tpu.matmul %48, %49, %cst_18 {dimension_numbers = #tpu.dot_dimension_numbers<[1], [0], [0], [1], [0, 0, 1, 1], [], []>} : vector<8x32xf32>, vector<32x32xf32>, vector<8x32xf32> -> vector<8x32xf32>
    %c136 = arith.constant 136 : index
    %c0_19 = arith.constant 0 : index
    %51 = vector.load %arg2[%c136, %c0_19] : memref<288x32xf32, #tpu.memory_space<vmem>>, vector<1x32xf32>
    %52 = vector.broadcast %51 : vector<1x32xf32> to vector<8x32xf32>
    %53 = arith.addf %50, %52 : vector<8x32xf32>
    %54 = arith.addf %5, %53 : vector<8x32xf32>
    %c144 = arith.constant 144 : index
    %c0_20 = arith.constant 0 : index
    %55 = vector.load %arg2[%c144, %c0_20] : memref<288x32xf32, #tpu.memory_space<vmem>>, vector<8x32xf32>
    %56 = arith.mulf %54, %55 : vector<8x32xf32>
    %c1_i32_21 = arith.constant 1 : i32
    %57 = tpu.dynamic_rotate %54 by %c1_i32_21 dim 0 : vector<8x32xf32>, i32 -> vector<8x32xf32>
    %c152 = arith.constant 152 : index
    %c0_22 = arith.constant 0 : index
    %58 = vector.load %arg2[%c152, %c0_22] : memref<288x32xf32, #tpu.memory_space<vmem>>, vector<8x32xf32>
    %59 = arith.mulf %57, %58 : vector<8x32xf32>
    %60 = arith.addf %56, %59 : vector<8x32xf32>
    %c2_i32_23 = arith.constant 2 : i32
    %61 = tpu.dynamic_rotate %54 by %c2_i32_23 dim 0 : vector<8x32xf32>, i32 -> vector<8x32xf32>
    %c160 = arith.constant 160 : index
    %c0_24 = arith.constant 0 : index
    %62 = vector.load %arg2[%c160, %c0_24] : memref<288x32xf32, #tpu.memory_space<vmem>>, vector<8x32xf32>
    %63 = arith.mulf %61, %62 : vector<8x32xf32>
    %64 = arith.addf %60, %63 : vector<8x32xf32>
    %c3_i32_25 = arith.constant 3 : i32
    %65 = tpu.dynamic_rotate %54 by %c3_i32_25 dim 0 : vector<8x32xf32>, i32 -> vector<8x32xf32>
    %c168 = arith.constant 168 : index
    %c0_26 = arith.constant 0 : index
    %66 = vector.load %arg2[%c168, %c0_26] : memref<288x32xf32, #tpu.memory_space<vmem>>, vector<8x32xf32>
    %67 = arith.mulf %65, %66 : vector<8x32xf32>
    %68 = arith.addf %64, %67 : vector<8x32xf32>
    %c4_i32_27 = arith.constant 4 : i32
    %69 = tpu.dynamic_rotate %54 by %c4_i32_27 dim 0 : vector<8x32xf32>, i32 -> vector<8x32xf32>
    %c176 = arith.constant 176 : index
    %c0_28 = arith.constant 0 : index
    %70 = vector.load %arg2[%c176, %c0_28] : memref<288x32xf32, #tpu.memory_space<vmem>>, vector<8x32xf32>
    %71 = arith.mulf %69, %70 : vector<8x32xf32>
    %72 = arith.addf %68, %71 : vector<8x32xf32>
    %c5_i32_29 = arith.constant 5 : i32
    %73 = tpu.dynamic_rotate %54 by %c5_i32_29 dim 0 : vector<8x32xf32>, i32 -> vector<8x32xf32>
    %c184 = arith.constant 184 : index
    %c0_30 = arith.constant 0 : index
    %74 = vector.load %arg2[%c184, %c0_30] : memref<288x32xf32, #tpu.memory_space<vmem>>, vector<8x32xf32>
    %75 = arith.mulf %73, %74 : vector<8x32xf32>
    %76 = arith.addf %72, %75 : vector<8x32xf32>
    %c6_i32_31 = arith.constant 6 : i32
    %77 = tpu.dynamic_rotate %54 by %c6_i32_31 dim 0 : vector<8x32xf32>, i32 -> vector<8x32xf32>
    %c192 = arith.constant 192 : index
    %c0_32 = arith.constant 0 : index
    %78 = vector.load %arg2[%c192, %c0_32] : memref<288x32xf32, #tpu.memory_space<vmem>>, vector<8x32xf32>
    %79 = arith.mulf %77, %78 : vector<8x32xf32>
    %80 = arith.addf %76, %79 : vector<8x32xf32>
    %c7_i32_33 = arith.constant 7 : i32
    %81 = tpu.dynamic_rotate %54 by %c7_i32_33 dim 0 : vector<8x32xf32>, i32 -> vector<8x32xf32>
    %c200 = arith.constant 200 : index
    %c0_34 = arith.constant 0 : index
    %82 = vector.load %arg2[%c200, %c0_34] : memref<288x32xf32, #tpu.memory_space<vmem>>, vector<8x32xf32>
    %83 = arith.mulf %81, %82 : vector<8x32xf32>
    %84 = arith.addf %80, %83 : vector<8x32xf32>
    %85 = arith.mulf %84, %84 : vector<8x32xf32>
    %86 = arith.mulf %84, %85 : vector<8x32xf32>
    %cst_35 = arith.constant 4.471500e-02 : f32
    %87 = vector.broadcast %cst_35 : f32 to vector<8x32xf32>
    %88 = arith.mulf %87, %86 : vector<8x32xf32>
    %89 = arith.addf %84, %88 : vector<8x32xf32>
    %cst_36 = arith.constant 0.797884583 : f32
    %90 = vector.broadcast %cst_36 : f32 to vector<8x32xf32>
    %91 = arith.mulf %90, %89 : vector<8x32xf32>
    %92 = math.tanh %91 : vector<8x32xf32>
    %cst_37 = arith.constant 1.000000e+00 : f32
    %93 = vector.broadcast %cst_37 : f32 to vector<8x32xf32>
    %94 = arith.addf %93, %92 : vector<8x32xf32>
    %cst_38 = arith.constant 5.000000e-01 : f32
    %95 = vector.broadcast %cst_38 : f32 to vector<8x32xf32>
    %96 = arith.mulf %95, %94 : vector<8x32xf32>
    %97 = arith.mulf %84, %96 : vector<8x32xf32>
    %c208 = arith.constant 208 : index
    %c0_39 = arith.constant 0 : index
    %98 = vector.load %arg2[%c208, %c0_39] : memref<288x32xf32, #tpu.memory_space<vmem>>, vector<32x32xf32>
    %cst_40 = arith.constant dense<0.000000e+00> : vector<8x32xf32>
    %99 = tpu.matmul %97, %98, %cst_40 {dimension_numbers = #tpu.dot_dimension_numbers<[1], [0], [0], [1], [0, 0, 1, 1], [], []>} : vector<8x32xf32>, vector<32x32xf32>, vector<8x32xf32> -> vector<8x32xf32>
    %c240 = arith.constant 240 : index
    %c0_41 = arith.constant 0 : index
    %100 = vector.load %arg2[%c240, %c0_41] : memref<288x32xf32, #tpu.memory_space<vmem>>, vector<1x32xf32>
    %101 = vector.broadcast %100 : vector<1x32xf32> to vector<8x32xf32>
    %102 = arith.addf %99, %101 : vector<8x32xf32>
    %103 = arith.addf %54, %102 : vector<8x32xf32>
    %cst_42 = arith.constant dense<0.000000e+00> : vector<8xf32>
    %104 = vector.multi_reduction <add>, %103, %cst_42 [1] : vector<8x32xf32> to vector<8xf32>
    %105 = vector.shape_cast %104 : vector<8xf32> to vector<8x1xf32>
    %cst_43 = arith.constant 3.200000e+01 : f32
    %106 = vector.broadcast %cst_43 : f32 to vector<8x1xf32>
    %107 = arith.divf %105, %106 : vector<8x1xf32>
    %108 = vector.broadcast %107 : vector<8x1xf32> to vector<8x32xf32>
    %109 = arith.subf %103, %108 : vector<8x32xf32>
    %110 = arith.mulf %109, %109 : vector<8x32xf32>
    %cst_44 = arith.constant dense<0.000000e+00> : vector<8xf32>
    %111 = vector.multi_reduction <add>, %110, %cst_44 [1] : vector<8x32xf32> to vector<8xf32>
    %112 = vector.shape_cast %111 : vector<8xf32> to vector<8x1xf32>
    %cst_45 = arith.constant 3.200000e+01 : f32
    %113 = vector.broadcast %cst_45 : f32 to vector<8x1xf32>
    %114 = arith.divf %112, %113 : vector<8x1xf32>
    %115 = vector.broadcast %107 : vector<8x1xf32> to vector<8x32xf32>
    %116 = arith.subf %103, %115 : vector<8x32xf32>
    %cst_46 = arith.constant 9.99999974E-6 : f32
    %117 = vector.broadcast %cst_46 : f32 to vector<8x1xf32>
    %118 = arith.addf %114, %117 : vector<8x1xf32>
    %119 = math.rsqrt %118 : vector<8x1xf32>
    %120 = vector.broadcast %119 : vector<8x1xf32> to vector<8x32xf32>
    %121 = arith.mulf %116, %120 : vector<8x32xf32>
    %c248 = arith.constant 248 : index
    %c0_47 = arith.constant 0 : index
    %122 = vector.load %arg2[%c248, %c0_47] : memref<288x32xf32, #tpu.memory_space<vmem>>, vector<32x32xf32>
    %cst_48 = arith.constant dense<0.000000e+00> : vector<8x32xf32>
    %123 = tpu.matmul %121, %122, %cst_48 {dimension_numbers = #tpu.dot_dimension_numbers<[1], [0], [0], [1], [0, 0, 1, 1], [], []>} : vector<8x32xf32>, vector<32x32xf32>, vector<8x32xf32> -> vector<8x32xf32>
    %c280 = arith.constant 280 : index
    %c0_49 = arith.constant 0 : index
    %124 = vector.load %arg2[%c280, %c0_49] : memref<288x32xf32, #tpu.memory_space<vmem>>, vector<1x32xf32>
    %125 = vector.broadcast %124 : vector<1x32xf32> to vector<8x32xf32>
    %126 = arith.addf %123, %125 : vector<8x32xf32>
    %127 = vector.extract_strided_slice %126 {offsets = [0, 0], sizes = [8, 2], strides = [1, 1]} : vector<8x32xf32> to vector<8x2xf32>
    %c0_50 = arith.constant 0 : index
    %c0_51 = arith.constant 0 : index
    %c0_52 = arith.constant 0 : index
    %128 = vector.load %arg3[%c0_50, %c0_51, %c0_52] : memref<1x8x2xf32, #tpu.memory_space<vmem>>, vector<1x8x2xf32>
    %129 = vector.shape_cast %128 : vector<1x8x2xf32> to vector<8x2xf32>
    %130 = vector.shape_cast %127 : vector<8x2xf32> to vector<1x8x2xf32>
    tpu.vector_store %arg3[%c0_50, %c0_51, %c0_52], %130 {strides = array<i32>} : memref<1x8x2xf32, #tpu.memory_space<vmem>>, vector<1x8x2xf32>,
    return
  }
  func.func @transform_0(%arg0: i32) -> (i32, i32, i32) {
    %c0_i32 = arith.constant 0 : i32
    %c0_i32_0 = arith.constant 0 : i32
    %c0_i32_1 = arith.constant 0 : i32
    return %arg0, %c0_i32, %c0_i32_0 : i32, i32, i32
  }
  func.func @transform_1(%arg0: i32) -> (i32, i32) {
    %c0_i32 = arith.constant 0 : i32
    %c0_i32_0 = arith.constant 0 : i32
    %c0_i32_1 = arith.constant 0 : i32
    return %c0_i32, %c0_i32_0 : i32, i32
  }
  func.func @transform_2(%arg0: i32) -> (i32, i32, i32) {
    %c0_i32 = arith.constant 0 : i32
    %c0_i32_0 = arith.constant 0 : i32
    %c0_i32_1 = arith.constant 0 : i32
    return %arg0, %c0_i32, %c0_i32_0 : i32, i32, i32
  }
}

</mosaic_0001>

<bundles_post_ra>
// kernel: prosody_predictor_v15.1
= control target key start
LH: loop header
LB: loop body
LE: loop exit
PB: predicated region body
PF: predicated region fallthrough
CT: control target
= control target key end

     0   :  { %s735_s9 = smov 0   ;;  %s897_s0 = inlined_call_operand.vmem [shape: f32[2,8,32], index: 0, kind: input, shape index: {}]   ;;  %s898_s1 = inlined_call_operand.vmem [shape: f32[288,32], index: 1, kind: input, shape index: {}]   ;;  %s899_s2 = inlined_call_operand.vmem [shape: f32[2,8,2], index: 2, kind: output, shape index: {}]  }
   0x1 LB: > { %s614_s10 = sadd.s32 4294967295, %s716_s9   ;;  %p618_p0 = scmp.ge.s32.totalorder %s716_s9, 1  ;;  %s716_s9 = sphi %s735_s9, %s12_s9  }
   0x2   : > { %p111_p1 = scmp.lt.s32.totalorder %s716_s9, 3 }
   0x4   : > { %p112_p2 = pnand %p618_p0, %p111_p1 }
   0x5   : > { %p131_p3 = scmp.lt.s32.totalorder (!%p112_p2), %s614_s10, 1 }
   0x6   : > { %115 = sbr.rel (%p112_p2) target bundleno = 1205 (0x4b5), region = 28 }
   0xb   : > { %v143_v0 = vld [vmem:[%s898_s1 + $0x18] sm:$0xff]  ;;  %v718_v1 = vmov 0.0   ;;  %v142_v2 = vld [vmem:[%s898_s1 + $0x10] sm:$0xff]  ;;  %vm719_vm0 = vmmov 0   ;;  %s901_s10 = smov (!%p131_p3, %s614_s10), 1  ;;  %v141_v3 = vld [vmem:[%s898_s1 + $0x8] sm:$0xff] }
   0xc   : > { %650 = vmatprep.subr.mxu0 %v718_v1  ;;  %658 = vmatprep.mubr.msk.f32.mxu0 %vm719_vm0, %v718_v1  ;;  %s619_s17 = sshll.u32 %s901_s10, 3  ;;  %v140_v4 = vld [vmem:[%s898_s1] sm:$0xff]  ;;  %vm145_vm1 = vcmask 261120   ;;  %v260_v7 = vld [vmem:[%s898_s1 + $0x78] sm:$0xff]  ;;  %v259_v8 = vld [vmem:[%s898_s1 + $0x70] sm:$0xff]  ;;  %vm559_vm2 = vcmask 15360  }
   0xd   : > { %651 = vmatpush3.msra.mxu0 %v143_v0  ;;  %661 = vmatprep.subr.mxu1 %v718_v1  ;;  %s134_s22 = scalar_lea.vmem %s897_s0, %s619_s17  ;;  %v261_v6 = vld [vmem:[%s898_s1 + $0x80] sm:$0xff]  ;;  %v258_v9 = vld [vmem:[%s898_s1 + $0x68] sm:$0xff]  ;;  %v222_v15 = vld [vmem:[%s898_s1 + $0x30] sm:$0xff]  ;;  %s138_s13 = scalar_lea.vmem %s899_s2, %s619_s17 }
   0xe   : > { %652 = vmatprep.subr.mxu0 %v718_v1  ;;  %669 = vmatprep.mubr.msk.f32.mxu1 %vm719_vm0, %v718_v1  ;;  %v139_v5 = vld [vmem:[%s134_s22] sm:$0xff]  ;;  %v219_v14 = vld [vmem:[%s898_s1 + $0x28] sm:$0xff]  ;;  %v226_v18 = vld [vmem:[%s898_s1 + $0x38] sm:$0xff] }
   0xf   : > { %653 = vmatpush3.msra.mxu0 %v142_v2  ;;  %662 = vmatpush3.msra.mxu1 %v261_v6  ;;  %v144_v10 = vld [vmem:[%s898_s1 + $0x20] sm:$0xff]  ;;  %v234_v26 = vld [vmem:[%s898_s1 + $0x48] sm:$0xff]  ;;  %v238_v30 = vld [vmem:[%s898_s1 + $0x50] sm:$0xff] }
  0x10   : > { %654 = vmatprep.subr.mxu0 %v718_v1  ;;  %663 = vmatprep.subr.mxu1 %v718_v1  ;;  %v230_v22 = vld [vmem:[%s898_s1 + $0x40] sm:$0xff]  ;;  %v242_v34 = vld [vmem:[%s898_s1 + $0x58] sm:$0xff]  ;;  %v383_v53 = vld [vmem:[%s898_s1 + $0xe8] sm:$0xff] }
  0x11   : > { %655 = vmatpush3.msra.mxu0 %v141_v3  ;;  %664 = vmatpush3.msra.mxu1 %v260_v7  ;;  %v246_v38 = vld [vmem:[%s898_s1 + $0x60] sm:$0xff]  ;;  %v381_v55 = vld [vmem:[%s898_s1 + $0xd8] sm:$0xff]  ;;  %v380_v56 = vld [vmem:[%s898_s1 + $0xd0] sm:$0xff] }
  0x12   : > { %656 = vmatprep.subr.mxu0 %v718_v1  ;;  %665 = vmatprep.subr.mxu1 %v718_v1  ;;  %v382_v54 = vld [vmem:[%s898_s1 + $0xe0] sm:$0xff]  ;;  %v622_v57 = vld [vmem:[%s898_s1 + $0x88] ss:$0 sm:$0xff]  ;;  %v341_v62 = vld [vmem:[%s898_s1 + $0x90] sm:$0xff] }
  0x13   : > { %657 = vmatpush3.msra.mxu0 %v140_v4  ;;  %666 = vmatpush3.msra.mxu1 %v259_v8  ;;  %v344_v63 = vld [vmem:[%s898_s1 + $0x98] sm:$0xff]  ;;  %v348_v3 = vld [vmem:[%s898_s1 + $0xa0] sm:$0xff]  ;;  %v352_v7 = vld [vmem:[%s898_s1 + $0xa8] sm:$0xff] }
  0x14   : > { %659 = vmatmul.mubr.msk.f32.vlgmr.msra.gmra.mxu0 %vm145_vm1, %v139_v5  ;;  %672 = vmatprep.subr.mxu0 %v718_v1 }
  0x15   : > { %680 = vmatprep.mubr.msk.f32.mxu0 %vm719_vm0, %v718_v1  ;;  %667 = vmatprep.subr.mxu1 %v718_v1 }
  0x16   : > { %668 = vmatpush3.msra.mxu1 %v258_v9  ;;  %673 = vmatpush3.msra.mxu0 %v383_v53 }
  0x17   : > { %683 = vmatprep.subr.mxu1 %v718_v1  ;;  %674 = vmatprep.subr.mxu0 %v718_v1 }
  0x18   : > { %675 = vmatpush3.msra.mxu0 %v382_v54 }
  0x19   : > { %676 = vmatprep.subr.mxu0 %v718_v1 }
  0x1a   : > { %677 = vmatpush3.msra.mxu0 %v381_v55 }
  0x1b   : > { %678 = vmatprep.subr.mxu0 %v718_v1 }
  0x1c   : > { %679 = vmatpush3.msra.mxu0 %v380_v56 }
  0xd4   : > { %v215_v11 = vpop.f32.mrf.mxu0 }
  0xd5   : > { %v216_v12 = vadd.f32 %v215_v11, %v144_v10  ;;  %v356_v11 = vld [vmem:[%s898_s1 + $0xb0] sm:$0xff] }
  0xd6   : > { %v660_v13 = vpop.f32.mrf.mxu0 }
  0xd7   : > { %v221_v16 = vrot.slane %v216_v12, 7  ;;  %v225_v17 = vrot.slane %v216_v12, 6  ;;  %v220_v19 = vmul.f32 %v219_v14, %v216_v12  ;;  %v229_v21 = vrot.slane %v216_v12, 5 }
  0xd8   : > { %v233_v25 = vrot.slane %v216_v12, 4  ;;  %v237_v29 = vrot.slane %v216_v12, 3  ;;  %v241_v33 = vrot.slane %v216_v12, 2  ;;  %v245_v37 = vrot.slane %v216_v12, 1 }
  0xd9   : > { %v223_v20 = vmul.f32 %v222_v15, %v221_v16  ;;  %v227_v24 = vmul.f32 %v226_v18, %v225_v17  ;;  %v231_v28 = vmul.f32 %v230_v22, %v229_v21  ;;  %v360_v15 = vld [vmem:[%s898_s1 + $0xb8] sm:$0xff] }
  0xda   : > { %v235_v32 = vmul.f32 %v234_v26, %v233_v25  ;;  %v239_v36 = vmul.f32 %v238_v30, %v237_v29  ;;  %v243_v40 = vmul.f32 %v242_v34, %v241_v33  ;;  %v247_v42 = vmul.f32 %v246_v38, %v245_v37  ;;  %v624_v38 = vld [vmem:[%s898_s1 + $0xf0] ss:$0 sm:$0xff] }
  0xdb   : > { %v224_v23 = vadd.f32 %v223_v20, %v220_v19  ;;  %v364_v19 = vld [vmem:[%s898_s1 + $0xc0] sm:$0xff] }
  0xdd   : > { %v228_v27 = vadd.f32 %v227_v24, %v224_v23  ;;  %v368_v23 = vld [vmem:[%s898_s1 + $0xc8] sm:$0xff] }
  0xdf   : > { %v232_v31 = vadd.f32 %v231_v28, %v228_v27 }
  0xe1   : > { %v236_v35 = vadd.f32 %v235_v32, %v232_v31 }
  0xe3   : > { %v240_v39 = vadd.f32 %v239_v36, %v236_v35 }
  0xe5   : > { %v244_v41 = vadd.f32 %v243_v40, %v240_v39 }
  0xe7   : > { %v248_v43 = vadd.f32 %v247_v42, %v244_v41 }
  0xe9   : > { %v249_v44 = vmul.f32 %v248_v43, %v248_v43 }
  0xeb   : > { %v250_v45 = vmul.f32 %v249_v44, %v248_v43 }
  0xed   : > { %v251_v46 = vmul.f32 0.044715, %v250_v45 }
  0xef   : > { %v252_v47 = vadd.f32 %v251_v46, %v248_v43 }
  0xf1   : > { %v253_v48 = vmul.f32 0.7978846, %v252_v47 }
  0xf3   : > { %704 = vtanh.f32 %v253_v48 }
 0x100   : > { %v705_v49 = vpop.eup %704 }
 0x101   : > { %v255_v50 = vadd.f32 1.0, %v705_v49  ;;  %v480_v49 = vld [vmem:[%s898_s1 + $0x110] sm:$0xff] }
 0x103   : > { %v256_v51 = vmul.f32 0.5, %v255_v50  ;;  %v479_v50 = vld [vmem:[%s898_s1 + $0x108] sm:$0xff] }
 0x105   : > { %v257_v52 = vmul.f32 %v256_v51, %v248_v43  ;;  %v478_v51 = vld [vmem:[%s898_s1 + $0x100] sm:$0xff] }
 0x107   : > { %670 = vmatmul.mubr.msk.f32.vlgmr.msra.gmra.mxu1 %vm145_vm1, %v257_v52  ;;  %v477_v52 = vld [vmem:[%s898_s1 + $0xf8] sm:$0xff] }
 0x108   : > { %691 = vmatprep.mubr.msk.f32.mxu1 %vm719_vm0, %v718_v1  ;;  %684 = vmatpush3.msra.mxu1 %v480_v49 }
 0x109   : > { %685 = vmatprep.subr.mxu1 %v718_v1 }
 0x10a   : > { %686 = vmatpush3.msra.mxu1 %v479_v50 }
 0x10b   : > { %687 = vmatprep.subr.mxu1 %v718_v1 }
 0x10c   : > { %688 = vmatpush3.msra.mxu1 %v478_v51 }
 0x10d   : > { %689 = vmatprep.subr.mxu1 %v718_v1 }
 0x10e   : > { %690 = vmatpush3.msra.mxu1 %v477_v52 }
 0x1c7   : > { %v336_v58 = vpop.f32.mrf.mxu1 }
 0x1c8   : > { %v337_v59 = vadd.f32 %v622_v57, %v336_v58  ;;  %v626_v58 = vld [vmem:[%s898_s1 + $0x118] ss:$0 sm:$0xff] }
 0x1c9   : > { %v671_v60 = vpop.f32.mrf.mxu1 }
 0x1ca   : > { %v340_v61 = vadd.f32 %v337_v59, %v216_v12 }
 0x1cc   : > { %v343_v0 = vrot.slane %v340_v61, 7  ;;  %v347_v2 = vrot.slane %v340_v61, 6  ;;  %v342_v4 = vmul.f32 %v341_v62, %v340_v61  ;;  %v351_v6 = vrot.slane %v340_v61, 5 }
 0x1cd   : > { %v355_v10 = vrot.slane %v340_v61, 4  ;;  %v359_v14 = vrot.slane %v340_v61, 3  ;;  %v363_v18 = vrot.slane %v340_v61, 2  ;;  %v367_v22 = vrot.slane %v340_v61, 1 }
 0x1ce   : > { %v345_v5 = vmul.f32 %v344_v63, %v343_v0  ;;  %v349_v9 = vmul.f32 %v348_v3, %v347_v2  ;;  %v353_v13 = vmul.f32 %v352_v7, %v351_v6 }
 0x1cf   : > { %v357_v17 = vmul.f32 %v356_v11, %v355_v10  ;;  %v361_v21 = vmul.f32 %v360_v15, %v359_v14  ;;  %v365_v25 = vmul.f32 %v364_v19, %v363_v18  ;;  %v369_v27 = vmul.f32 %v368_v23, %v367_v22 }
 0x1d0   : > { %v346_v8 = vadd.f32 %v345_v5, %v342_v4 }
 0x1d2   : > { %v350_v12 = vadd.f32 %v349_v9, %v346_v8 }
 0x1d4   : > { %v354_v16 = vadd.f32 %v353_v13, %v350_v12 }
 0x1d6   : > { %v358_v20 = vadd.f32 %v357_v17, %v354_v16 }
 0x1d8   : > { %v362_v24 = vadd.f32 %v361_v21, %v358_v20 }
 0x1da   : > { %v366_v26 = vadd.f32 %v365_v25, %v362_v24 }
 0x1dc   : > { %v370_v28 = vadd.f32 %v369_v27, %v366_v26 }
 0x1de   : > { %v371_v29 = vmul.f32 %v370_v28, %v370_v28 }
 0x1e0   : > { %v372_v30 = vmul.f32 %v371_v29, %v370_v28 }
 0x1e2   : > { %v373_v31 = vmul.f32 0.044715, %v372_v30 }
 0x1e4   : > { %v374_v32 = vadd.f32 %v373_v31, %v370_v28 }
 0x1e6   : > { %v375_v33 = vmul.f32 0.7978846, %v374_v32 }
 0x1e8   : > { %706 = vtanh.f32 %v375_v33 }
 0x1f5   : > { %v707_v34 = vpop.eup %706 }
 0x1f6   : > { %v377_v35 = vadd.f32 1.0, %v707_v34 }
 0x1f8   : > { %v378_v36 = vmul.f32 0.5, %v377_v35 }
 0x1fa   : > { %v379_v37 = vmul.f32 %v378_v36, %v370_v28 }
 0x1fc   : > { %681 = vmatmul.mubr.msk.f32.vlgmr.msra.gmra.mxu0 %vm145_vm1, %v379_v37 }
 0x2bc   : > { %v458_v39 = vpop.f32.mrf.mxu0 }
 0x2bd   : > { %v459_v40 = vadd.f32 %v624_v38, %v458_v39 }
 0x2be   : > { %v682_v41 = vpop.f32.mrf.mxu0 }
 0x2bf   : > { %v462_v42 = vadd.f32 %v459_v40, %v340_v61 }
 0x2c1   : > { %v463_v43 = vsel %vm145_vm1, %v462_v42, 0.0 }
 0x2c2   : > { %464 = vadd.xlane.f32.xlu0 %v463_v43 }
 0x34b   : > { %v465_v44 = vpop.xlane.xlu0 %464 }
 0x34c   : > { %v467_v45 = vmul.f32 0.03125, %v465_v44 }
 0x34e   : > { %v468_v46 = vsub.f32 %v462_v42, %v467_v45 }
 0x350   : > { %v469_v47 = vmul.f32 %v468_v46, %v468_v46 }
 0x352   : > { %v470_v48 = vsel %vm145_vm1, %v469_v47, 0.0 }
 0x353   : > { %471 = vadd.xlane.f32.xlu0 %v470_v48 }
 0x3dc   : > { %v472_v53 = vpop.xlane.xlu0 %471 }
 0x3dd   : > { %v473_v54 = vmul.f32 0.03125, %v472_v53 }
 0x3df   : > { %v474_v55 = vadd.f32 1e-05, %v473_v54 }
 0x3e1   : > { %708 = vrsqrt.f32 %v474_v55 }
 0x3ee   : > { %v709_v56 = vpop.eup %708 }
 0x3ef   : > { %v476_v57 = vmul.f32 %v709_v56, %v468_v46 }
 0x3f1   : > { %692 = vmatmul.mubr.msk.f32.vlgmr.msra.gmra.mxu1 %vm145_vm1, %v476_v57 }
 0x4b1   : > { %v555_v59 = vpop.f32.mrf.mxu1 }
 0x4b2   : > { %v556_v1 = vadd.f32 %v626_v58, %v555_v59 }
 0x4b3   : > { %v693_v60 = vpop.f32.mrf.mxu1 }
 0x4b4   : > { %560 = vst.msk [vmem:[%s138_s13] sm:$0xff] %vm559_vm2, %v556_v1 }
 0x4b5 PF: > { %s12_s9 = sadd.s32 1, %s716_s9  }
 0x4b6   : > { %p9_p4 = scmp.ge.s32.totalorder %s12_s9, 4  }
 0x4b8   :  { %11 = sbr.rel (!%p9_p4) target bundleno = 1 (0x1), region = 58 }

</bundles_post_ra>
